<compile_context>
chip_gen: v7x
topology: tpu7x:2x2x1
jax: 0.10.0
libtpu: 0.0.40
codegen_flags: <defaults>
</compile_context>

<pallas_src>
import jax
import jax.numpy as jnp
import numpy as np
from jax.experimental import pallas as pl
from jax.experimental.pallas import tpu as pltpu

BIAS_LANES = 512  # >= max padded layer width, 128-aligned


def _round_up(x, m):
    return (x + m - 1) // m * m


def actor_kernel(x_ref, w1_ref, w2_ref, w3_ref, b_ref, o_ref):
    h1p = w1_ref.shape[1]   # 512
    h2p = w2_ref.shape[1]   # 384
    outp = w3_ref.shape[1]  # 128

    # Activations cast to bf16 right before each MXU dot (no-op if the caller
    # already feeds bf16 state); accumulation and all elementwise math stay f32.
    x = x_ref[...].astype(jnp.bfloat16)

    # Layer 1: Linear(24 -> 400, padded to 512) + ReLU
    h1 = jnp.dot(x, w1_ref[...], preferred_element_type=jnp.float32)
    h1 = jnp.maximum(h1 + b_ref[0:1, 0:h1p], 0.0)

    # Layer 2: Linear(400 -> 300, padded 512 -> 384) + ReLU
    h2 = jnp.dot(h1.astype(jnp.bfloat16), w2_ref[...],
                 preferred_element_type=jnp.float32)
    h2 = jnp.maximum(h2 + b_ref[1:2, 0:h2p], 0.0)

    # Layer 3: Linear(300 -> 4, padded 384 -> 128) + tanh; pad lanes are
    # tanh(0 + 0) = 0, so the full 128-lane store is clean and unmasked.
    h3 = jnp.dot(h2.astype(jnp.bfloat16), w3_ref[...],
                 preferred_element_type=jnp.float32)
    o_ref[...] = jnp.tanh(h3 + b_ref[2:3, 0:outp]).astype(o_ref.dtype)


def init_params(key):
    """Torch-default-style init (uniform +/- 1/sqrt(fan_in)).

    Weights stored as bf16 (MXU-native, halves weight DMA); biases stay f32.
    """
    dims = [(24, 400), (400, 300), (300, 4)]
    params = []
    for fan_in, fan_out in dims:
        kw, kb, key = jax.random.split(key, 3)
        bound = 1.0 / np.sqrt(fan_in)
        w = jax.random.uniform(kw, (fan_in, fan_out), jnp.float32, -bound, bound)
        b = jax.random.uniform(kb, (1, fan_out), jnp.float32, -bound, bound)
        params += [w.astype(jnp.bfloat16), b]
    return params


def prepare_params(params):
    """One-time packing/padding for the kernel.

    Weights are zero-padded to 128-lane-aligned feature widths (identity math),
    biases packed into a single (3, BIAS_LANES) f32 buffer.
    """
    w1, b1, w2, b2, w3, b3 = params
    d_in, d_h1 = w1.shape
    d_h2 = w2.shape[1]
    d_out = w3.shape[1]

    h1p = _round_up(d_h1, 128)    # 400 -> 512
    h2p = _round_up(d_h2, 128)    # 300 -> 384
    outp = _round_up(d_out, 128)  # 4   -> 128
    assert max(h1p, h2p, outp) <= BIAS_LANES, "layer width exceeds packed bias buffer"

    w1p = jnp.pad(w1.astype(jnp.bfloat16), ((0, 0), (0, h1p - d_h1)))
    w2p = jnp.pad(w2.astype(jnp.bfloat16), ((0, h1p - d_h1), (0, h2p - d_h2)))
    w3p = jnp.pad(w3.astype(jnp.bfloat16), ((0, h2p - d_h2), (0, outp - d_out)))

    def pad_bias(b):
        return jnp.pad(b.astype(jnp.float32), ((0, 0), (0, BIAS_LANES - b.shape[1])))

    bias = jnp.concatenate([pad_bias(b1), pad_bias(b2), pad_bias(b3)], axis=0)
    return w1p, w2p, w3p, bias, d_out


def actor_forward(state, kernel_params, *, batch_tile=512):
    """state: (B, 24) f32 (or bf16) -> (B, 4) f32."""
    w1, w2, w3, bias, d_out = kernel_params
    B, d_in = state.shape
    h1p, h2p, outp = w1.shape[1], w2.shape[1], w3.shape[1]

    # Tile selection: big tiles (few grid steps) for large B; for mid-size B
    # split into two tiles so both TensorCores get work on v7x.
    if B > batch_tile:
        tb = batch_tile
    elif B >= 64:
        tb = _round_up(pl.cdiv(B, 2), 16)
    else:
        tb = B
    grid = (pl.cdiv(B, tb),)

    flops = 2 * B * (d_in * h1p + h1p * h2p + h2p * outp)
    bytes_accessed = (
        state.size * state.dtype.itemsize
        + (w1.size + w2.size + w3.size) * 2   # bf16 weights (fetched once)
        + bias.size * 4
        + B * outp * 4                        # lane-dense f32 output
    )

    out = pl.pallas_call(
        actor_kernel,
        out_shape=jax.ShapeDtypeStruct((B, outp), jnp.float32),
        grid_spec=pltpu.PrefetchScalarGridSpec(
            num_scalar_prefetch=0,
            grid=grid,
            in_specs=[
                pl.BlockSpec((tb, d_in), lambda i: (i, 0)),   # activations stream
                pl.BlockSpec(w1.shape, lambda i: (0, 0)),     # weights VMEM-resident
                pl.BlockSpec(w2.shape, lambda i: (0, 0)),
                pl.BlockSpec(w3.shape, lambda i: (0, 0)),
                pl.BlockSpec(bias.shape, lambda i: (0, 0)),   # packed biases
            ],
            out_specs=pl.BlockSpec((tb, outp), lambda i: (i, 0)),
        ),
        compiler_params=pltpu.CompilerParams(
            dimension_semantics=("parallel",),   # shard batch across TCs on v7x
        ),
        cost_estimate=pl.CostEstimate(
            flops=flops,
            transcendentals=B * outp,
            bytes_accessed=bytes_accessed,
        ),
    )(state, w1, w2, w3, bias)

    # Drop the zero pad lanes; consumers that can take the padded slab may
    # skip this slice entirely.
    return out[:, :d_out]


def reference_forward(state, params):
    """Pure-JAX reference using the same bf16-weight / f32-accumulate recipe."""
    w1, b1, w2, b2, w3, b3 = params
    x = state.astype(jnp.bfloat16)
    h1 = jnp.maximum(jnp.dot(x, w1, preferred_element_type=jnp.float32) + b1, 0.0)
    h2 = jnp.maximum(
        jnp.dot(h1.astype(jnp.bfloat16), w2, preferred_element_type=jnp.float32) + b2,
        0.0,
    )
    return jnp.tanh(
        jnp.dot(h2.astype(jnp.bfloat16), w3, preferred_element_type=jnp.float32) + b3
    )


if __name__ == "__main__":
    key = jax.random.PRNGKey(0)
    kx, kp = jax.random.split(key)
    B = 8
    state = jax.random.normal(kx, (B, 24), jnp.float32)
    params = init_params(kp)
    kernel_params = prepare_params(params)

    out = jax.block_until_ready(actor_forward(state, kernel_params))

    ref = reference_forward(state, params)
    np.testing.assert_allclose(
        np.asarray(out), np.asarray(ref, dtype=np.float32), rtol=2e-5, atol=2e-5
    )
    assert out.shape == (B, 4)
    print("KERNEL_OK")
</pallas_src>

<mosaic_0001>
module attributes {stable_mosaic.version = 11 : i64} {
  func.func @actor_kernel(%arg0: i32, %arg1: memref<8x24xf32, #tpu.memory_space<vmem>>, %arg2: memref<24x512xbf16, #tpu.memory_space<vmem>>, %arg3: memref<512x384xbf16, #tpu.memory_space<vmem>>, %arg4: memref<384x128xbf16, #tpu.memory_space<vmem>>, %arg5: memref<3x512xf32, #tpu.memory_space<vmem>>, %arg6: memref<8x128xf32, #tpu.memory_space<vmem>>) attributes {dimension_semantics = [#tpu.dimension_semantics<parallel>], iteration_bounds = array<i64: 1>, scalar_prefetch = 0 : i64, scratch_operands = 0 : i64, tpu.core_type = #tpu.core_type<tc>, window_params = [{transform_indices = @transform_0, window_bounds = array<i64: 8, 24>}, {pipeline_mode = #tpu.pipeline_mode<synchronous>, transform_indices = @transform_1, window_bounds = array<i64: 24, 512>}, {pipeline_mode = #tpu.pipeline_mode<synchronous>, transform_indices = @transform_2, window_bounds = array<i64: 512, 384>}, {pipeline_mode = #tpu.pipeline_mode<synchronous>, transform_indices = @transform_3, window_bounds = array<i64: 384, 128>}, {pipeline_mode = #tpu.pipeline_mode<synchronous>, transform_indices = @transform_4, window_bounds = array<i64: 3, 512>}, {transform_indices = @transform_5, window_bounds = array<i64: 8, 128>}]} {
    %c0 = arith.constant 0 : index
    %c0_0 = arith.constant 0 : index
    %0 = vector.load %arg1[%c0, %c0_0] : memref<8x24xf32, #tpu.memory_space<vmem>>, vector<8x24xf32>
    %1 = arith.truncf %0 : vector<8x24xf32> to vector<8x24xbf16>
    %c0_1 = arith.constant 0 : index
    %c0_2 = arith.constant 0 : index
    %2 = vector.load %arg2[%c0_1, %c0_2] : memref<24x512xbf16, #tpu.memory_space<vmem>>, vector<24x512xbf16>
    %cst = arith.constant dense<0.000000e+00> : vector<8x512xf32>
    %3 = tpu.matmul %1, %2, %cst {dimension_numbers = #tpu.dot_dimension_numbers<[1], [0], [0], [1], [0, 0, 1, 1], [], []>} : vector<8x24xbf16>, vector<24x512xbf16>, vector<8x512xf32> -> vector<8x512xf32>
    %c0_3 = arith.constant 0 : index
    %c0_4 = arith.constant 0 : index
    %4 = vector.load %arg5[%c0_3, %c0_4] : memref<3x512xf32, #tpu.memory_space<vmem>>, vector<1x512xf32>
    %5 = vector.broadcast %4 : vector<1x512xf32> to vector<8x512xf32>
    %6 = arith.addf %3, %5 : vector<8x512xf32>
    %cst_5 = arith.constant 0.000000e+00 : f32
    %7 = vector.broadcast %cst_5 : f32 to vector<8x512xf32>
    %8 = arith.maximumf %6, %7 : vector<8x512xf32>
    %9 = arith.truncf %8 : vector<8x512xf32> to vector<8x512xbf16>
    %c0_6 = arith.constant 0 : index
    %c0_7 = arith.constant 0 : index
    %10 = vector.load %arg3[%c0_6, %c0_7] : memref<512x384xbf16, #tpu.memory_space<vmem>>, vector<512x384xbf16>
    %cst_8 = arith.constant dense<0.000000e+00> : vector<8x384xf32>
    %11 = tpu.matmul %9, %10, %cst_8 {dimension_numbers = #tpu.dot_dimension_numbers<[1], [0], [0], [1], [0, 0, 1, 1], [], []>} : vector<8x512xbf16>, vector<512x384xbf16>, vector<8x384xf32> -> vector<8x384xf32>
    %c1 = arith.constant 1 : index
    %c0_9 = arith.constant 0 : index
    %12 = vector.load %arg5[%c1, %c0_9] : memref<3x512xf32, #tpu.memory_space<vmem>>, vector<1x384xf32>
    %13 = vector.broadcast %12 : vector<1x384xf32> to vector<8x384xf32>
    %14 = arith.addf %11, %13 : vector<8x384xf32>
    %cst_10 = arith.constant 0.000000e+00 : f32
    %15 = vector.broadcast %cst_10 : f32 to vector<8x384xf32>
    %16 = arith.maximumf %14, %15 : vector<8x384xf32>
    %17 = arith.truncf %16 : vector<8x384xf32> to vector<8x384xbf16>
    %c0_11 = arith.constant 0 : index
    %c0_12 = arith.constant 0 : index
    %18 = vector.load %arg4[%c0_11, %c0_12] : memref<384x128xbf16, #tpu.memory_space<vmem>>, vector<384x128xbf16>
    %cst_13 = arith.constant dense<0.000000e+00> : vector<8x128xf32>
    %19 = tpu.matmul %17, %18, %cst_13 {dimension_numbers = #tpu.dot_dimension_numbers<[1], [0], [0], [1], [0, 0, 1, 1], [], []>} : vector<8x384xbf16>, vector<384x128xbf16>, vector<8x128xf32> -> vector<8x128xf32>
    %c2 = arith.constant 2 : index
    %c0_14 = arith.constant 0 : index
    %20 = vector.load %arg5[%c2, %c0_14] : memref<3x512xf32, #tpu.memory_space<vmem>>, vector<1x128xf32>
    %21 = vector.broadcast %20 : vector<1x128xf32> to vector<8x128xf32>
    %22 = arith.addf %19, %21 : vector<8x128xf32>
    %23 = math.tanh %22 : vector<8x128xf32>
    %c0_15 = arith.constant 0 : index
    %c0_16 = arith.constant 0 : index
    %24 = vector.load %arg6[%c0_15, %c0_16] : memref<8x128xf32, #tpu.memory_space<vmem>>, vector<8x128xf32>
    tpu.vector_store %arg6[%c0_15, %c0_16], %23 {strides = array<i32>} : memref<8x128xf32, #tpu.memory_space<vmem>>, vector<8x128xf32>,
    return
  }
  func.func @transform_0(%arg0: i32) -> (i32, i32) {
    %c0_i32 = arith.constant 0 : i32
    %c0_i32_0 = arith.constant 0 : i32
    return %arg0, %c0_i32 : i32, i32
  }
  func.func @transform_1(%arg0: i32) -> (i32, i32) {
    %c0_i32 = arith.constant 0 : i32
    %c0_i32_0 = arith.constant 0 : i32
    %c0_i32_1 = arith.constant 0 : i32
    return %c0_i32, %c0_i32_0 : i32, i32
  }
  func.func @transform_2(%arg0: i32) -> (i32, i32) {
    %c0_i32 = arith.constant 0 : i32
    %c0_i32_0 = arith.constant 0 : i32
    %c0_i32_1 = arith.constant 0 : i32
    return %c0_i32, %c0_i32_0 : i32, i32
  }
  func.func @transform_3(%arg0: i32) -> (i32, i32) {
    %c0_i32 = arith.constant 0 : i32
    %c0_i32_0 = arith.constant 0 : i32
    %c0_i32_1 = arith.constant 0 : i32
    return %c0_i32, %c0_i32_0 : i32, i32
  }
  func.func @transform_4(%arg0: i32) -> (i32, i32) {
    %c0_i32 = arith.constant 0 : i32
    %c0_i32_0 = arith.constant 0 : i32
    %c0_i32_1 = arith.constant 0 : i32
    return %c0_i32, %c0_i32_0 : i32, i32
  }
  func.func @transform_5(%arg0: i32) -> (i32, i32) {
    %c0_i32 = arith.constant 0 : i32
    %c0_i32_0 = arith.constant 0 : i32
    return %arg0, %c0_i32 : i32, i32
  }
}

</mosaic_0001>

<bundles_post_ra>
// kernel: tpu_custom_call.1
= control target key start
LH: loop header
LB: loop body
LE: loop exit
PB: predicated region body
PF: predicated region fallthrough
CT: control target
= control target key end

     0   :  { %10 = vsyncpa [#allocation3], 0  ;;  %s2083_s0 = inlined_call_operand.hbm [shape: f32[8,24], index: 0, kind: input, shape index: {}]   ;;  %s2084_s1 = inlined_call_operand.hbm [shape: bf16[24,512], index: 1, kind: input, shape index: {}]   ;;  %s2085_s2 = inlined_call_operand.hbm [shape: bf16[512,384], index: 2, kind: input, shape index: {}]   ;;  %s2086_s3 = inlined_call_operand.hbm [shape: bf16[384,128], index: 3, kind: input, shape index: {}]   ;;  %s2087_s4 = inlined_call_operand.hbm [shape: f32[3,512], index: 4, kind: input, shape index: {}]   ;;  %s2088_s5 = inlined_call_operand.hbm [shape: f32[8,128], index: 5, kind: output, shape index: {}]  }
   0x1   :  { %11 = vsyncpa [#allocation6], 0 }
   0x2   :  { %12 = vsyncpa [#allocation9], 0 }
   0x3   :  { %13 = vsyncpa [#allocation4], 0  ;;  %s1928_s18 = smov [#allocation5]   ;;  %s1788_s22 = scalar_lea.hbm %s2084_s1, 768 }
   0x4   :  { %s29_s19 = sshll.u32 %s1928_s18, 4  ;;  %p1789_p0 = scmp.ne.s32.totalorder %s2084_s1, %s1788_s22  ;;  %s30_s19 = int_to_ptr.vmem [resolvable:$true] %s29_s19 }
   0x5   :  { %p1792_p1 = scmp.lt.u32.totalorder %s1788_s22, %s2084_s1 }
   0x7   :  { %p1794_p2 = pnand %p1792_p1, %p1789_p0 }
   0x9   :  { %1797 = shalt.err (!%p1794_p2)
}
   0xa   :  { %s1798_s27 = scalar_lea.vmem %s30_s19, 768  ;;  %p1803_p4 = scmp.lt.s32.totalorder %s30_s19, %s30_s19 }
   0xb   :  { %p1799_p3 = scmp.ne.s32.totalorder %s30_s19, %s1798_s27  ;;  %p1804_p5 = scmp.lt.s32.totalorder %s1798_s27, %s1798_s27 }
   0xd   :  { %p1805_p6 = por %p1804_p5, %p1803_p4 }
   0xf   :  { %p1806_p7 = pnand %p1805_p6, %p1799_p3 }
  0x11   :  { %1809 = shalt.err (!%p1806_p7)
}
  0x12   :  { %s1929_s28 = smov 256   ;;  %s1930_s29 = smov 16  }
  0x13   :  { %35 = dma.hbm_to_vmem [thread:$0]  %s2084_s1, 768, %s30_s19, [#allocation6], %s1929_s28, %s1929_s28, %s1930_s29  }
  0x14   :  { %s1931_s7 = smov [#allocation8]   ;;  %s1810_s11 = scalar_lea.hbm %s2086_s3, 3072 }
  0x15   :  { %s53_s8 = sshll.u32 %s1931_s7, 4  ;;  %p1811_p8 = scmp.ne.s32.totalorder %s2086_s3, %s1810_s11  ;;  %s54_s8 = int_to_ptr.vmem [resolvable:$true] %s53_s8 }
  0x16   :  { %p1814_p9 = scmp.lt.u32.totalorder %s1810_s11, %s2086_s3 }
  0x18   :  { %p1816_p10 = pnand %p1814_p9, %p1811_p8 }
  0x1a   :  { %1819 = shalt.err (!%p1816_p10)
}
  0x1b   :  { %s1820_s16 = scalar_lea.vmem %s54_s8, 3072  ;;  %p1825_p12 = scmp.lt.s32.totalorder %s54_s8, %s54_s8 }
  0x1c   :  { %p1821_p11 = scmp.ne.s32.totalorder %s54_s8, %s1820_s16  ;;  %p1826_p13 = scmp.lt.s32.totalorder %s1820_s16, %s1820_s16 }
  0x1e   :  { %p1827_p0 = por %p1826_p13, %p1825_p12 }
  0x20   :  { %p1828_p1 = pnand %p1827_p0, %p1821_p11 }
  0x22   :  { %1831 = shalt.err (!%p1828_p1)
}
  0x23   :  { %s1932_s1 = smov 64   ;;  %s1933_s17 = smov 4  }
  0x24   :  { %59 = dma.hbm_to_vmem [thread:$0]  %s2086_s3, 3072, %s54_s8, [#allocation9], %s1932_s1, %s1932_s1, %s1933_s17  }
  0x25   :  { %s1934_s20 = smov [#allocation2]   ;;  %s1935_s22 = smov [#allocation7]  }
  0x26   :  { %s20_s21 = sshll.u32 %s1934_s20, 4  ;;  %s41_s23 = sshll.u32 %s1935_s22, 4  ;;  %s21_s21 = int_to_ptr.vmem [resolvable:$true] %s20_s21  ;;  %s1997_s23 = int_to_ptr.vmem [resolvable:$true] %s41_s23 }
  0x27   :  { %s1832_s26 = scalar_lea.hbm %s2083_s0, 128 }
  0x28   :  { %p1833_p2 = scmp.ne.s32.totalorder %s2083_s0, %s1832_s26  ;;  %p1836_p3 = scmp.lt.u32.totalorder %s1832_s26, %s2083_s0 }
  0x2a   :  { %p1838_p4 = pnand %p1836_p3, %p1833_p2 }
  0x2c   :  { %1841 = shalt.err (!%p1838_p4)
}
  0x2d   :  { %s1842_s3 = scalar_lea.vmem %s21_s21, 128  ;;  %p1847_p6 = scmp.lt.s32.totalorder %s21_s21, %s21_s21 }
  0x2e   :  { %p1843_p5 = scmp.ne.s32.totalorder %s21_s21, %s1842_s3  ;;  %p1848_p7 = scmp.lt.s32.totalorder %s1842_s3, %s1842_s3 }
  0x30   :  { %p1849_p8 = por %p1848_p7, %p1847_p6 }
  0x32   :  { %p1850_p9 = pnand %p1849_p8, %p1843_p5 }
  0x34   :  { %1853 = shalt.err (!%p1850_p9)
}
  0x35   :  { %23 = dma.hbm_to_vmem [thread:$0]  %s2083_s0, 128, %s21_s21, [#allocation3]  }
  0x36   :  { %s1854_s10 = scalar_lea.hbm %s2085_s2, 12288 }
  0x37   :  { %p1855_p10 = scmp.ne.s32.totalorder %s2085_s2, %s1854_s10  ;;  %p1858_p11 = scmp.lt.u32.totalorder %s1854_s10, %s2085_s2 }
  0x39   :  { %p1860_p12 = pnand %p1858_p11, %p1855_p10 }
  0x3b   :  { %1863 = shalt.err (!%p1860_p12)
}
  0x3c   :  { %s1864_s15 = scalar_lea.vmem %s1997_s23, 12288  ;;  %p1869_p0 = scmp.lt.s32.totalorder %s1997_s23, %s1997_s23 }
  0x3d   :  { %p1865_p13 = scmp.ne.s32.totalorder %s1997_s23, %s1864_s15  ;;  %p1870_p1 = scmp.lt.s32.totalorder %s1864_s15, %s1864_s15 }
  0x3f   :  { %p1871_p2 = por %p1870_p1, %p1869_p0 }
  0x41   :  { %p1872_p3 = pnand %p1871_p2, %p1865_p13 }
  0x43   :  { %1875 = shalt.err (!%p1872_p3)
}
  0x44   :  { %s1936_s0 = smov 192   ;;  %s1937_s16 = smov 12  }
  0x45   :  { %47 = dma.hbm_to_vmem [thread:$0]  %s2085_s2, 12288, %s1997_s23, [#allocation6], %s1936_s0, %s1936_s0, %s1937_s16  }
  0x46   :  { %s1938_s18 = smov [#allocation10]   ;;  %s1876_s22 = scalar_lea.hbm %s2087_s4, 256 }
  0x47   :  { %s66_s19 = sshll.u32 %s1938_s18, 4  ;;  %p1877_p4 = scmp.ne.s32.totalorder %s2087_s4, %s1876_s22  ;;  %s67_s19 = int_to_ptr.vmem [resolvable:$true] %s66_s19 }
  0x48   :  { %p1880_p5 = scmp.lt.u32.totalorder %s1876_s22, %s2087_s4 }
  0x4a   :  { %p1882_p6 = pnand %p1880_p5, %p1877_p4 }
  0x4c   :  { %1885 = shalt.err (!%p1882_p6)
}
  0x4d   :  { %s1886_s28 = scalar_lea.vmem %s67_s19, 256  ;;  %p1891_p8 = scmp.lt.s32.totalorder %s67_s19, %s67_s19 }
  0x4e   :  { %p1887_p7 = scmp.ne.s32.totalorder %s67_s19, %s1886_s28  ;;  %p1892_p9 = scmp.lt.s32.totalorder %s1886_s28, %s1886_s28 }
  0x50   :  { %p1893_p10 = por %p1892_p9, %p1891_p8 }
  0x52   :  { %p1894_p11 = pnand %p1893_p10, %p1887_p7 }
  0x54   :  { %1897 = shalt.err (!%p1894_p11)
}
  0x55   :  { %69 = dma.hbm_to_vmem [thread:$0]  %s2087_s4, 256, %s67_s19, [#allocation9]  }
  0x56   :  { %1920 = dma.done.wait [#allocation3], 128  }
  0x57   :  { %1921 = vsyncadd [#allocation3], 4294967168 }
  0x58   :  { %1922 = dma.done.wait [#allocation6], 13056  }
  0x59   :  { %1923 = vsyncadd [#allocation6], 4294954240 }
  0x5a   :  { %1924 = dma.done.wait [#allocation9], 3328  }
  0x5b   :  { %1925 = vsyncadd [#allocation9], 4294963968  ;;  %v1939_v0 = vmov 0   ;;  %v1624_v1 = vld [vmem:[#allocation5 + $0x4] ss:$16 sps:$4 sm:$0xff]   ;;  %vm150_vm0 = vcmask 1043456  }
  0x5c   :  { %195 = vmatprep.mubr.bf16.mxu0 %v1939_v0  ;;  %236 = vmatprep.mubr.bf16.mxu1 %v1939_v0  ;;  %v1626_v2 = vld [vmem:[#allocation5] ss:$16 sps:$4 sm:$0xff]   ;;  %v86_v4 = vld [vmem:[#allocation2] sm:$0xff]  ;;  %v93_v9 = vld [vmem:[#allocation5 + $0x28] sm:$0xff]  ;;  %vm146_vm1 = vcmask 195584   ;;  %vm1941_vm2 = vmmov 0  }
  0x5d   :  { %v92_v3 = vld [vmem:[#allocation5 + $0x20] sm:$0xff]  ;;  %163 = vmatprep.subr.bf16.mxu0 %v1624_v1  ;;  %v1629_v7 = vld [vmem:[#allocation5 + $0xc] ss:$16 sps:$4 sm:$0xff]   ;;  %v1631_v8 = vld [vmem:[#allocation5 + $0x8] ss:$16 sps:$4 sm:$0xff]   ;;  %v1382_v11 = vcombine.high %v93_v9, %v93_v9  ;;  %v1381_v12 = vcombine.low %v93_v9, %v93_v9  ;;  %v87_v14 = vpack.c.bf16 %v86_v4, %v86_v4  ;;  %v96_v1 = vlaneseq  ;;  %s1942_s4 = smov [#allocation11]  }
  0x5e   :  { %v1380_v5 = vcombine.high %v92_v3, %v92_v3  ;;  %v1379_v6 = vcombine.low %v92_v3, %v92_v3  ;;  %164 = vmatpush1.bf16.msra.mxu0 %v1626_v2  ;;  %204 = vmatprep.subr.bf16.mxu1 %v1629_v7  ;;  %v1636_v13 = vld [vmem:[#allocation7 + $0x4] ss:$12 sps:$4 sm:$0xff]   ;;  %v1634_v16 = vld [vmem:[#allocation7] ss:$12 sps:$4 sm:$0xff]   ;;  %v1639_v17 = vld [vmem:[#allocation7 + $0x1c] ss:$12 sps:$4 sm:$0xff]  }
  0x5f   :  { %205 = vmatpush1.bf16.msra.mxu1 %v1631_v8  ;;  %v158_v15 = vsel %vm150_vm0, %v1381_v12, 0  ;;  %v1637_v18 = vld [vmem:[#allocation7 + $0x18] ss:$12 sps:$4 sm:$0xff]   ;;  %v1642_v19 = vld [vmem:[#allocation7 + $0x34] ss:$12 sps:$4 sm:$0xff]   ;;  %v2044_v2 = vshrl.u32 %v96_v1, 7 }
  0x60   :  { %1383 = vmatprep.subr.msk.bf16.mxu0 %vm150_vm0, %v1380_v5  ;;  %v152_v10 = vsel %vm150_vm0, %v1379_v6, 0  ;;  %1385 = vmatprep.subr.msk.bf16.mxu1 %vm150_vm0, %v1382_v11  ;;  %v1640_v20 = vld [vmem:[#allocation7 + $0x30] ss:$12 sps:$4 sm:$0xff]   ;;  %v1645_v21 = vld [vmem:[#allocation7 + $0x4c] ss:$12 sps:$4 sm:$0xff]   ;;  %s1364_s29 = sshll.u32 %s1942_s4, 4  ;;  %s1365_s29 = int_to_ptr.vmem [resolvable:$true] %s1364_s29 }
  0x61   :  { %v1661_v22 = vld [vmem:[#allocation7 + $0xc8] ss:$12 sps:$4 sm:$0xff]   ;;  %v1648_v25 = vld [vmem:[#allocation7 + $0x64] ss:$12 sps:$4 sm:$0xff]   ;;  %v1666_v26 = vld [vmem:[#allocation7 + $0xe0] ss:$12 sps:$4 sm:$0xff]   ;;  %p1903_p13 = scmp.lt.s32.totalorder %s1365_s29, %s1365_s29 }
  0x62   :  { %166 = vmatpush1.bf16.msra.mxu0 %v152_v10  ;;  %v1662_v23 = vld [vmem:[#allocation7 + $0x8] ss:$12 sps:$4 sm:$0xff]   ;;  %v1667_v27 = vld [vmem:[#allocation7 + $0x20] ss:$12 sps:$4 sm:$0xff]   ;;  %v1671_v30 = vld [vmem:[#allocation7 + $0xf8] ss:$12 sps:$4 sm:$0xff]  }
  0x63   :  { %911 = vmatprep.subr.bf16.mxu0 %v1636_v13  ;;  %207 = vmatpush1.bf16.msra.mxu1 %v158_v15  ;;  %v1643_v24 = vld [vmem:[#allocation7 + $0x48] ss:$12 sps:$4 sm:$0xff]   ;;  %v1646_v28 = vld [vmem:[#allocation7 + $0x60] ss:$12 sps:$4 sm:$0xff]   ;;  %v1672_v31 = vld [vmem:[#allocation7 + $0x38] ss:$12 sps:$4 sm:$0xff]  }
  0x64   :  { %1508 = vmatprep.subr.bf16.mxu1 %v1661_v22  ;;  %v1651_v29 = vld [vmem:[#allocation7 + $0x7c] ss:$12 sps:$4 sm:$0xff]   ;;  %v1649_v32 = vld [vmem:[#allocation7 + $0x78] ss:$12 sps:$4 sm:$0xff]   ;;  %v1654_v35 = vld [vmem:[#allocation7 + $0x94] ss:$12 sps:$4 sm:$0xff]  }
  0x65   :  { %1384 = vmatmul.mubr.msk.bf16.vlgmr.msra.gmra.mrb[0].mxu0 %vm146_vm1, %v87_v14  ;;  %v1676_v33 = vld [vmem:[#allocation7 + $0x110] ss:$12 sps:$4 sm:$0xff]   ;;  %v1681_v36 = vld [vmem:[#allocation7 + $0x128] ss:$12 sps:$4 sm:$0xff]   ;;  %v1657_v39 = vld [vmem:[#allocation7 + $0xac] ss:$12 sps:$4 sm:$0xff]  }
  0x66   :  { %912 = vmatpush1.bf16.msra.mxu0 %v1634_v16  ;;  %1386 = vmatmul.mubr.msk.bf16.vlgmr.msra.gmra.mrb[0].mxu1 %vm146_vm1, %v87_v14  ;;  %v1677_v34 = vld [vmem:[#allocation7 + $0x50] ss:$12 sps:$4 sm:$0xff]   ;;  %v1682_v38 = vld [vmem:[#allocation7 + $0x68] ss:$12 sps:$4 sm:$0xff]   ;;  %v1686_v41 = vld [vmem:[#allocation7 + $0x140] ss:$12 sps:$4 sm:$0xff]  }
  0x67   :  { %913 = vmatprep.subr.bf16.mxu0 %v1639_v17  ;;  %1509 = vmatpush3.bf16.msra.mxu1 %v1662_v23  ;;  %v1652_v37 = vld [vmem:[#allocation7 + $0x90] ss:$12 sps:$4 sm:$0xff]   ;;  %v1655_v40 = vld [vmem:[#allocation7 + $0xa8] ss:$12 sps:$4 sm:$0xff]   ;;  %v1687_v43 = vld [vmem:[#allocation7 + $0x80] ss:$12 sps:$4 sm:$0xff]  }
  0x68   :  { %1510 = vmatprep.subr.bf16.mxu1 %v1666_v26  ;;  %v1660_v42 = vld [vmem:[#allocation7 + $0xc4] ss:$12 sps:$4 sm:$0xff]   ;;  %v1658_v44 = vld [vmem:[#allocation7 + $0xc0] ss:$12 sps:$4 sm:$0xff]   ;;  %v1665_v45 = vld [vmem:[#allocation7 + $0xdc] ss:$12 sps:$4 sm:$0xff]  }
  0x69   :  { %v1663_v46 = vld [vmem:[#allocation7 + $0xd8] ss:$12 sps:$4 sm:$0xff]   ;;  %v1670_v47 = vld [vmem:[#allocation7 + $0xf4] ss:$12 sps:$4 sm:$0xff]   ;;  %v1668_v48 = vld [vmem:[#allocation7 + $0xf0] ss:$12 sps:$4 sm:$0xff]  }
  0x6a   :  { %914 = vmatpush1.bf16.msra.mxu0 %v1637_v18  ;;  %v1675_v49 = vld [vmem:[#allocation7 + $0x10c] ss:$12 sps:$4 sm:$0xff]   ;;  %v1673_v50 = vld [vmem:[#allocation7 + $0x108] ss:$12 sps:$4 sm:$0xff]   ;;  %v1680_v51 = vld [vmem:[#allocation7 + $0x124] ss:$12 sps:$4 sm:$0xff]  }
  0x6b   :  { %915 = vmatprep.subr.bf16.mxu0 %v1642_v19  ;;  %1511 = vmatpush3.bf16.msra.mxu1 %v1667_v27  ;;  %v1678_v52 = vld [vmem:[#allocation7 + $0x120] ss:$12 sps:$4 sm:$0xff]   ;;  %v1685_v53 = vld [vmem:[#allocation7 + $0x13c] ss:$12 sps:$4 sm:$0xff]   ;;  %v1683_v54 = vld [vmem:[#allocation7 + $0x138] ss:$12 sps:$4 sm:$0xff]  }
  0x6c   :  { %1512 = vmatprep.subr.bf16.mxu1 %v1671_v30  ;;  %v1690_v55 = vld [vmem:[#allocation7 + $0x154] ss:$12 sps:$4 sm:$0xff]   ;;  %v1691_v56 = vld [vmem:[#allocation7 + $0x158] ss:$12 sps:$4 sm:$0xff]   ;;  %v1688_v57 = vld [vmem:[#allocation7 + $0x150] ss:$12 sps:$4 sm:$0xff]  }
  0x6d   :  { %v1692_v58 = vld [vmem:[#allocation7 + $0x98] ss:$12 sps:$4 sm:$0xff]   ;;  %v1696_v60 = vld [vmem:[#allocation7 + $0x170] ss:$12 sps:$4 sm:$0xff]   ;;  %v1693_v61 = vld [vmem:[#allocation7 + $0x168] ss:$12 sps:$4 sm:$0xff]  }
  0x6e   :  { %916 = vmatpush1.bf16.msra.mxu0 %v1640_v20  ;;  %v1695_v59 = vld [vmem:[#allocation7 + $0x16c] ss:$12 sps:$4 sm:$0xff]   ;;  %v1697_v62 = vld [vmem:[#allocation7 + $0xb0] ss:$12 sps:$4 sm:$0xff]   ;;  %v1701_v0 = vld [vmem:[#allocation7 + $0x248] ss:$12 sps:$4 sm:$0xff]  }
  0x6f   :  { %917 = vmatprep.subr.bf16.mxu0 %v1645_v21  ;;  %1513 = vmatpush3.bf16.msra.mxu1 %v1672_v31  ;;  %v1700_v63 = vld [vmem:[#allocation7 + $0x184] ss:$12 sps:$4 sm:$0xff]   ;;  %v98_v3 = vsub.s32 0, %v2044_v2  ;;  %v102_v5 = vsub.s32 1, %v2044_v2  ;;  %v110_v6 = vsub.s32 3, %v2044_v2  ;;  %s1898_s30 = scalar_lea.vmem %s1365_s29, 128 }
  0x70   :  { %1514 = vmatprep.subr.bf16.mxu1 %v1676_v33  ;;  %v2047_v4 = vld [vmem:[#allocation10] ss:$4 sm:$0xf]  ;;  %p1899_p12 = scmp.ne.s32.totalorder %s1365_s29, %s1898_s30  ;;  %p1904_p0 = scmp.lt.s32.totalorder %s1898_s30, %s1898_s30 }
  0x71   :  { %v99_v7 = vrot.slane %v2047_v4, %v98_v3  ;;  %v103_v8 = vrot.slane %v2047_v4, %v102_v5  ;;  %v111_v10 = vrot.slane %v2047_v4, %v110_v6  ;;  %v1703_v31 = vld [vmem:[#allocation7 + $0x198] ss:$12 sps:$4 sm:$0xff]   ;;  %v1710_v33 = vld [vmem:[#allocation7 + $0x1b4] ss:$12 sps:$4 sm:$0xff]   ;;  %v1744_v6 = vld [vmem:[#allocation7 + $0x270] ss:$12 sps:$4 sm:$0xff]  }
  0x72   :  { %918 = vmatpush1.bf16.msra.mxu0 %v1643_v24  ;;  %v1698_v24 = vld [vmem:[#allocation7 + $0x180] ss:$12 sps:$4 sm:$0xff]   ;;  %v1741_v1 = vld [vmem:[#allocation7 + $0x258] ss:$12 sps:$4 sm:$0xff]   ;;  %p1905_p1 = por %p1904_p0, %p1903_p13 }
  0x73   :  { %919 = vmatprep.subr.bf16.mxu0 %v1648_v25  ;;  %1515 = vmatpush3.bf16.msra.mxu1 %v1677_v34  ;;  %v1702_v25 = vld [vmem:[#allocation7 + $0x188] ss:$12 sps:$4 sm:$0xff]   ;;  %v1711_v34 = vld [vmem:[#allocation7 + $0x278] ss:$12 sps:$4 sm:$0xff]  }
  0x74   :  { %1516 = vmatprep.subr.bf16.mxu1 %v1681_v36  ;;  %v1712_v36 = vld [vmem:[#allocation7 + $0x1b8] ss:$12 sps:$4 sm:$0xff]   ;;  %p1906_p2 = pnand %p1905_p1, %p1899_p12 }
  0x76   :  { %920 = vmatpush1.bf16.msra.mxu0 %v1646_v28  ;;  %v1705_v28 = vld [vmem:[#allocation7 + $0x19c] ss:$12 sps:$4 sm:$0xff]  }
  0x77   :  { %921 = vmatprep.subr.bf16.mxu0 %v1651_v29  ;;  %1517 = vmatpush3.bf16.msra.mxu1 %v1682_v38  ;;  %v1706_v29 = vld [vmem:[#allocation7 + $0x260] ss:$12 sps:$4 sm:$0xff]   ;;  %v1716_v38 = vld [vmem:[#allocation7 + $0x290] ss:$12 sps:$4 sm:$0xff]  }
  0x78   :  { %1518 = vmatprep.subr.bf16.mxu1 %v1686_v41  ;;  %v1720_v41 = vld [vmem:[#allocation7 + $0x1e4] ss:$12 sps:$4 sm:$0xff]  }
  0x7a   :  { %922 = vmatpush1.bf16.msra.mxu0 %v1649_v32  ;;  %v1707_v32 = vld [vmem:[#allocation7 + $0x1a0] ss:$12 sps:$4 sm:$0xff]  }
  0x7b   :  { %923 = vmatprep.subr.bf16.mxu0 %v1654_v35  ;;  %1519 = vmatpush3.bf16.msra.mxu1 %v1687_v43  ;;  %v1708_v35 = vld [vmem:[#allocation7 + $0x1b0] ss:$12 sps:$4 sm:$0xff]   ;;  %v106_v43 = vsub.s32 2, %v2044_v2 }
  0x7c   :  { %1520 = vmatprep.subr.bf16.mxu1 %v1691_v56  ;;  %v1735_v56 = vld [vmem:[#allocation7 + $0x22c] ss:$12 sps:$4 sm:$0xff]   ;;  %v1780_v2 = vld [vmem:[#allocation8 + $0x90] sm:$0xff]  }
  0x7e   :  { %924 = vmatpush1.bf16.msra.mxu0 %v1652_v37  ;;  %v1715_v37 = vld [vmem:[#allocation7 + $0x1cc] ss:$12 sps:$4 sm:$0xff]  }
  0x7f   :  { %925 = vmatprep.subr.bf16.mxu0 %v1657_v39  ;;  %1521 = vmatpush3.bf16.msra.mxu1 %v1692_v58  ;;  %v1713_v39 = vld [vmem:[#allocation7 + $0x1c8] ss:$12 sps:$4 sm:$0xff]  }
  0x80   :  { %1522 = vmatprep.subr.bf16.mxu1 %v1696_v60  ;;  %v1737_v60 = vld [vmem:[#allocation7 + $0x230] ss:$12 sps:$4 sm:$0xff]  }
  0x82   :  { %926 = vmatpush1.bf16.msra.mxu0 %v1655_v40  ;;  %v1717_v40 = vld [vmem:[#allocation7 + $0x1d0] ss:$12 sps:$4 sm:$0xff]  }
  0x83   :  { %927 = vmatprep.subr.bf16.mxu0 %v1660_v42  ;;  %1523 = vmatpush3.bf16.msra.mxu1 %v1697_v62  ;;  %v1721_v42 = vld [vmem:[#allocation7 + $0x2a8] ss:$12 sps:$4 sm:$0xff]  }
  0x84   :  { %1530 = vmatprep.subr.bf16.mxu1 %v1701_v0  ;;  %v1743_v0 = vld [vmem:[#allocation7 + $0x25c] ss:$12 sps:$4 sm:$0xff]  }
  0x86   :  { %928 = vmatpush1.bf16.msra.mxu0 %v1658_v44  ;;  %v1718_v44 = vld [vmem:[#allocation7 + $0x1e0] ss:$12 sps:$4 sm:$0xff]  }
  0x87   :  { %929 = vmatprep.subr.bf16.mxu0 %v1665_v45  ;;  %v1722_v45 = vld [vmem:[#allocation7 + $0x1e8] ss:$12 sps:$4 sm:$0xff]  }
  0x8a   :  { %930 = vmatpush1.bf16.msra.mxu0 %v1663_v46  ;;  %v1725_v46 = vld [vmem:[#allocation7 + $0x1fc] ss:$12 sps:$4 sm:$0xff]  }
  0x8b   :  { %931 = vmatprep.subr.bf16.mxu0 %v1670_v47  ;;  %v1726_v47 = vld [vmem:[#allocation7 + $0x2c0] ss:$12 sps:$4 sm:$0xff]  }
  0x8e   :  { %932 = vmatpush1.bf16.msra.mxu0 %v1668_v48  ;;  %v107_v48 = vrot.slane %v2047_v4, %v106_v43  ;;  %v1746_v4 = vld [vmem:[#allocation7 + $0x274] ss:$12 sps:$4 sm:$0xff]  }
  0x8f   :  { %933 = vmatprep.subr.bf16.mxu0 %v1675_v49  ;;  %v1723_v49 = vld [vmem:[#allocation7 + $0x1f8] ss:$12 sps:$4 sm:$0xff]  }
  0x92   :  { %934 = vmatpush1.bf16.msra.mxu0 %v1673_v50  ;;  %v1727_v50 = vld [vmem:[#allocation7 + $0x200] ss:$12 sps:$4 sm:$0xff]  }
  0x93   :  { %935 = vmatprep.subr.bf16.mxu0 %v1680_v51  ;;  %v1730_v51 = vld [vmem:[#allocation7 + $0x214] ss:$12 sps:$4 sm:$0xff]  }
  0x96   :  { %936 = vmatpush1.bf16.msra.mxu0 %v1678_v52  ;;  %v1731_v52 = vld [vmem:[#allocation7 + $0x2d8] ss:$12 sps:$4 sm:$0xff]  }
  0x97   :  { %937 = vmatprep.subr.bf16.mxu0 %v1685_v53 }
  0x9a   :  { %938 = vmatpush1.bf16.msra.mxu0 %v1683_v54  ;;  %v1728_v54 = vld [vmem:[#allocation7 + $0x210] ss:$12 sps:$4 sm:$0xff]  }
  0x9b   :  { %939 = vmatprep.subr.bf16.mxu0 %v1690_v55  ;;  %v1732_v55 = vld [vmem:[#allocation7 + $0x218] ss:$12 sps:$4 sm:$0xff]  }
  0x9e   :  { %940 = vmatpush1.bf16.msra.mxu0 %v1688_v57  ;;  %v1736_v57 = vld [vmem:[#allocation7 + $0x2f0] ss:$12 sps:$4 sm:$0xff]  }
  0x9f   :  { %941 = vmatprep.subr.bf16.mxu0 %v1695_v59  ;;  %v1733_v59 = vld [vmem:[#allocation7 + $0x228] ss:$12 sps:$4 sm:$0xff]  }
  0xa2   :  { %942 = vmatpush1.bf16.msra.mxu0 %v1693_v61  ;;  %v1740_v61 = vld [vmem:[#allocation7 + $0x244] ss:$12 sps:$4 sm:$0xff]  }
  0xa3   :  { %952 = vmatprep.subr.bf16.mxu0 %v1700_v63  ;;  %v1738_v63 = vld [vmem:[#allocation7 + $0x240] ss:$12 sps:$4 sm:$0xff]  }
 0x138   :  { %v197_v9 = vpop.f32.mrb[0].mxu0 }
 0x139   :  { %v198_v11 = vadd.f32 %v197_v9, %v99_v7  ;;  %v199_v12 = vpop.f32.mrb[1].mxu0  ;;  %v2058_v15 = vpop.f32.mrb[0].mxu1  ;;  %v1749_v7 = vld [vmem:[#allocation7 + $0x28c] ss:$12 sps:$4 sm:$0xff]   ;;  %v1752_v9 = vld [vmem:[#allocation7 + $0x2a4] ss:$12 sps:$4 sm:$0xff]  }
 0x13a   :  { %v200_v13 = vadd.f32 %v199_v12, %v103_v8  ;;  %v201_v14 = vpop.f32.mrb[2].mxu0  ;;  %v240_v18 = vpop.f32.mrb[1].mxu1  ;;  %v239_v53 = vadd.f32 %v2058_v15, %v107_v48  ;;  %v1747_v8 = vld [vmem:[#allocation7 + $0x288] ss:$12 sps:$4 sm:$0xff]   ;;  %v1753_v12 = vld [vmem:[#allocation7 + $0x2b8] ss:$12 sps:$4 sm:$0xff]  }
 0x13b   :  { %v245_v16 = vmax.f32 %v198_v11, 0.0  ;;  %v202_v17 = vpop.f32.mrb[3].mxu0  ;;  %v241_v20 = vadd.f32 %v240_v18, %v111_v10  ;;  %v242_v21 = vpop.f32.mrb[2].mxu1  ;;  %v1750_v10 = vld [vmem:[#allocation7 + $0x2a0] ss:$12 sps:$4 sm:$0xff]  }
 0x13c   :  { %v246_v19 = vmax.f32 %v200_v13, 0.0  ;;  %v243_v22 = vpop.f32.mrb[3].mxu1  ;;  %v247_v58 = vmax.f32 %v239_v53, 0.0  ;;  %v1755_v11 = vld [vmem:[#allocation7 + $0x2bc] ss:$12 sps:$4 sm:$0xff]   ;;  %v1762_v17 = vld [vmem:[#allocation8 + $0x40] sm:$0xff]  }
 0x13d   :  { %v248_v26 = vmax.f32 %v241_v20, 0.0  ;;  %v249_v27 = vpack.c.bf16 %v245_v16, %v245_v16  ;;  %v1758_v13 = vld [vmem:[#allocation7 + $0x2d4] ss:$12 sps:$4 sm:$0xff]   ;;  %v1756_v14 = vld [vmem:[#allocation7 + $0x2d0] ss:$12 sps:$4 sm:$0xff]   ;;  %v1765_v20 = vld [vmem:[#allocation8 + $0x8] sm:$0xff]  }
 0x13e   :  { %v250_v23 = vpack.c.bf16 %v246_v19, %v246_v19  ;;  %v251_v62 = vpack.c.bf16 %v247_v58, %v247_v58  ;;  %v1761_v15 = vld [vmem:[#allocation7 + $0x2ec] ss:$12 sps:$4 sm:$0xff]   ;;  %v1759_v16 = vld [vmem:[#allocation7 + $0x2e8] ss:$12 sps:$4 sm:$0xff]   ;;  %v1763_v18 = vld [vmem:[#allocation8] sm:$0xff]  }
 0x13f   :  { %v252_v30 = vpack.c.bf16 %v248_v26, %v248_v26  ;;  %v1764_v19 = vld [vmem:[#allocation8 + $0x48] sm:$0xff]   ;;  %v1766_v21 = vld [vmem:[#allocation8 + $0x50] sm:$0xff]   ;;  %v1771_v26 = vld [vmem:[#allocation8 + $0x20] sm:$0xff]  }
 0x140   :  { %943 = vmatprep.mubr.bf16.mxu0 %v250_v23  ;;  %1025 = vmatprep.mubr.bf16.mxu1 %v250_v23  ;;  %v1767_v22 = vld [vmem:[#allocation8 + $0x10] sm:$0xff]   ;;  %v1768_v23 = vld [vmem:[#allocation8 + $0x58] sm:$0xff]  }
 0x141   :  { %944 = vmatmul.mubr.bf16.vlgmr.msra.gmra.mrb[4].mxu0 %v249_v27  ;;  %1026 = vmatmul.mubr.bf16.vlgmr.msra.gmra.mrb[4].mxu1 %v249_v27  ;;  %v1772_v27 = vld [vmem:[#allocation8 + $0x68] sm:$0xff]  }
 0x142   :  { %953 = vmatpush1.bf16.msra.mxu0 %v1698_v24  ;;  %1531 = vmatpush3.bf16.msra.mxu1 %v1702_v25  ;;  %v1769_v24 = vld [vmem:[#allocation8 + $0x18] sm:$0xff]   ;;  %v1770_v25 = vld [vmem:[#allocation8 + $0x60] sm:$0xff]  }
 0x143   :  { %954 = vmatprep.subr.bf16.mxu0 %v1705_v28  ;;  %1532 = vmatprep.subr.bf16.mxu1 %v1706_v29  ;;  %v1773_v28 = vld [vmem:[#allocation8 + $0x28] sm:$0xff]   ;;  %v1774_v29 = vld [vmem:[#allocation8 + $0x70] sm:$0xff]  }
 0x144   :  { %1065 = vmatprep.mubr.bf16.mxu1 %v252_v30  ;;  %984 = vmatprep.mubr.bf16.mxu0 %v252_v30  ;;  %v1775_v30 = vld [vmem:[#allocation8 + $0x30] sm:$0xff]  }
 0x146   :  { %955 = vmatpush1.bf16.msra.mxu0 %v1703_v31  ;;  %1533 = vmatpush3.bf16.msra.mxu1 %v1707_v32  ;;  %v1776_v31 = vld [vmem:[#allocation8 + $0x78] sm:$0xff]  }
 0x147   :  { %956 = vmatprep.subr.bf16.mxu0 %v1710_v33  ;;  %1534 = vmatprep.subr.bf16.mxu1 %v1711_v34  ;;  %v1777_v32 = vld [vmem:[#allocation8 + $0x38] sm:$0xff]   ;;  %v1940_v33 = vmov 0.0  }
 0x14a   :  { %957 = vmatpush1.bf16.msra.mxu0 %v1708_v35  ;;  %1535 = vmatpush3.bf16.msra.mxu1 %v1712_v36 }
 0x14b   :  { %958 = vmatprep.subr.bf16.mxu0 %v1715_v37  ;;  %1536 = vmatprep.subr.bf16.mxu1 %v1716_v38 }
 0x14e   :  { %959 = vmatpush1.bf16.msra.mxu0 %v1713_v39  ;;  %1537 = vmatpush3.bf16.msra.mxu1 %v1717_v40  ;;  %v382_v39 = vld [vmem:[#allocation10 + $0x1] ss:$4 sm:$0x7] }
 0x14f   :  { %960 = vmatprep.subr.bf16.mxu0 %v1720_v41  ;;  %1538 = vmatprep.subr.bf16.mxu1 %v1721_v42  ;;  %v395_v40 = vrot.slane %v382_v39, %v106_v43 }
 0x152   :  { %961 = vmatpush1.bf16.msra.mxu0 %v1718_v44  ;;  %1539 = vmatpush3.bf16.msra.mxu1 %v1722_v45 }
 0x153   :  { %962 = vmatprep.subr.bf16.mxu0 %v1725_v46  ;;  %1540 = vmatprep.subr.bf16.mxu1 %v1726_v47 }
 0x156   :  { %963 = vmatpush1.bf16.msra.mxu0 %v1723_v49  ;;  %1541 = vmatpush3.bf16.msra.mxu1 %v1727_v50  ;;  %v387_v49 = vrot.slane %v382_v39, %v98_v3  ;;  %v391_v50 = vrot.slane %v382_v39, %v102_v5  ;;  %v1781_v3 = vld [vmem:[#allocation8 + $0x98] sm:$0xff]   ;;  %v1782_v5 = vld [vmem:[#allocation8 + $0xa0] sm:$0xff]  }
 0x157   :  { %964 = vmatprep.subr.bf16.mxu0 %v1730_v51  ;;  %1542 = vmatprep.subr.bf16.mxu1 %v1731_v52 }
 0x15a   :  { %965 = vmatpush1.bf16.msra.mxu0 %v1728_v54  ;;  %1543 = vmatpush3.bf16.msra.mxu1 %v1732_v55 }
 0x15b   :  { %966 = vmatprep.subr.bf16.mxu0 %v1735_v56  ;;  %1544 = vmatprep.subr.bf16.mxu1 %v1736_v57 }
 0x15e   :  { %967 = vmatpush1.bf16.msra.mxu0 %v1733_v59  ;;  %1545 = vmatpush3.bf16.msra.mxu1 %v1737_v60  ;;  %v1778_v59 = vld [vmem:[#allocation8 + $0x80] sm:$0xff]  }
 0x15f   :  { %968 = vmatprep.subr.bf16.mxu0 %v1740_v61  ;;  %1552 = vmatprep.subr.bf16.mxu1 %v1762_v17  ;;  %v1779_v61 = vld [vmem:[#allocation8 + $0x88] sm:$0xff]  }
 0x161   :  { %1066 = vmatmul.mubr.bf16.vlgmr.msra.gmra.mrb[8].mxu1 %v251_v62 }
 0x162   :  { %969 = vmatpush1.bf16.msra.mxu0 %v1738_v63  ;;  %1553 = vmatpush3.bf16.msra.mxu1 %v1763_v18  ;;  %v1784_v63 = vld [vmem:[#allocation8 + $0xb0] sm:$0xff]  }
 0x163   :  { %970 = vmatprep.subr.bf16.mxu0 %v1743_v0  ;;  %1554 = vmatprep.subr.bf16.mxu1 %v1764_v19  ;;  %v1785_v0 = vld [vmem:[#allocation8 + $0xb8] sm:$0xff]  }
 0x166   :  { %971 = vmatpush1.bf16.msra.mxu0 %v1741_v1  ;;  %1555 = vmatpush3.bf16.msra.mxu1 %v1765_v20 }
 0x167   :  { %972 = vmatprep.subr.bf16.mxu0 %v1746_v4  ;;  %1556 = vmatprep.subr.bf16.mxu1 %v1766_v21 }
 0x16a   :  { %973 = vmatpush1.bf16.msra.mxu0 %v1744_v6  ;;  %1557 = vmatpush3.bf16.msra.mxu1 %v1767_v22 }
 0x16b   :  { %974 = vmatprep.subr.bf16.mxu0 %v1749_v7  ;;  %1558 = vmatprep.subr.bf16.mxu1 %v1768_v23 }
 0x16e   :  { %975 = vmatpush1.bf16.msra.mxu0 %v1747_v8  ;;  %1559 = vmatpush3.bf16.msra.mxu1 %v1769_v24 }
 0x16f   :  { %976 = vmatprep.subr.bf16.mxu0 %v1752_v9  ;;  %1560 = vmatprep.subr.bf16.mxu1 %v1770_v25 }
 0x172   :  { %977 = vmatpush1.bf16.msra.mxu0 %v1750_v10  ;;  %1561 = vmatpush3.bf16.msra.mxu1 %v1771_v26 }
 0x173   :  { %978 = vmatprep.subr.bf16.mxu0 %v1755_v11  ;;  %1562 = vmatprep.subr.bf16.mxu1 %v1772_v27  ;;  %v1483_v11 = vld [vmem:[#allocation10 + $0x2] ss:$0 sm:$0xff] }
 0x176   :  { %979 = vmatpush1.bf16.msra.mxu0 %v1753_v12  ;;  %1563 = vmatpush3.bf16.msra.mxu1 %v1773_v28 }
 0x177   :  { %980 = vmatprep.subr.bf16.mxu0 %v1758_v13  ;;  %1564 = vmatprep.subr.bf16.mxu1 %v1774_v29 }
 0x17a   :  { %981 = vmatpush1.bf16.msra.mxu0 %v1756_v14  ;;  %1565 = vmatpush3.bf16.msra.mxu1 %v1775_v30 }
 0x17b   :  { %982 = vmatprep.subr.bf16.mxu0 %v1761_v15  ;;  %1566 = vmatprep.subr.bf16.mxu1 %v1776_v31 }
 0x17e   :  { %983 = vmatpush1.bf16.msra.mxu0 %v1759_v16  ;;  %1567 = vmatpush3.bf16.msra.mxu1 %v1777_v32 }
 0x17f   :  { %1583 = vmatprep.subr.bf16.mxu1 %v1940_v33 }
 0x181   :  { %985 = vmatmul.mubr.bf16.vlgmr.msra.gmra.mrb[4].mxu0 %v251_v62  ;;  %v1783_v62 = vld [vmem:[#allocation8 + $0xa8] sm:$0xff]  }
 0x214   :  { %v1524_v34 = vpop.f32.mrb[4].mxu1 }
 0x215   :  { %v1525_v35 = vpop.f32.mrb[5].mxu1 }
 0x216   :  { %v1526_v36 = vadd.f32 %v1525_v35, %v1524_v34  ;;  %v1527_v37 = vpop.f32.mrb[6].mxu1 }
 0x217   :  { %v1528_v38 = vpop.f32.mrb[7].mxu1 }
 0x218   :  { %v1028_v44 = vadd.f32 %v1526_v36, %v395_v40 }
 0x234   :  { %v1546_v41 = vpop.f32.mrb[8].mxu1 }
 0x235   :  { %v1547_v42 = vpop.f32.mrb[9].mxu1 }
 0x236   :  { %v1548_v45 = vadd.f32 %v1547_v42, %v1546_v41  ;;  %v1549_v46 = vpop.f32.mrb[10].mxu1 }
 0x237   :  { %v1550_v47 = vpop.f32.mrb[11].mxu1 }
 0x238   :  { %v1068_v48 = vadd.f32 %v1548_v45, %v1028_v44 }
 0x23a   :  { %v1075_v1 = vmax.f32 %v1068_v48, 0.0 }
 0x23c   :  { %v1078_v4 = vpack.c.bf16 %v1075_v1, %v1075_v1 }
 0x254   :  { %v986_v51 = vpop.f32.mrb[4].mxu0 }
 0x255   :  { %v1603_v52 = vadd.f32 %v986_v51, %v387_v49  ;;  %v988_v53 = vpop.f32.mrb[5].mxu0 }
 0x256   :  { %v1604_v54 = vadd.f32 %v988_v53, %v391_v50  ;;  %v990_v55 = vpop.f32.mrb[6].mxu0 }
 0x257   :  { %v1073_v56 = vmax.f32 %v1603_v52, 0.0  ;;  %v991_v43 = vpop.f32.mrb[7].mxu0 }
 0x258   :  { %v1074_v57 = vmax.f32 %v1604_v54, 0.0 }
 0x259   :  { %v1076_v60 = vpack.c.bf16 %v1073_v56, %v1073_v56 }
 0x25a   :  { %v1077_v58 = vpack.c.bf16 %v1074_v57, %v1074_v57 }
 0x25c   :  { %1308 = vmatprep.mubr.bf16.mxu1 %v1077_v58 }
 0x25d   :  { %1309 = vmatmul.mubr.bf16.vlgmr.msra.gmra.mrb[12].mxu1 %v1076_v60 }
 0x25e   :  { %1584 = vmatpush3.bf16.msra.mxu1 %v1778_v59  ;;  %1599 = vmatprep.mubr.msk.bf16.mxu1 %vm1941_vm2, %v1940_v33 }
 0x25f   :  { %1585 = vmatprep.subr.bf16.mxu1 %v1940_v33 }
 0x262   :  { %1586 = vmatpush3.bf16.msra.mxu1 %v1779_v61 }
 0x263   :  { %1587 = vmatprep.subr.bf16.mxu1 %v1940_v33 }
 0x266   :  { %1588 = vmatpush3.bf16.msra.mxu1 %v1780_v2 }
 0x267   :  { %1589 = vmatprep.subr.bf16.mxu1 %v1940_v33 }
 0x26a   :  { %1590 = vmatpush3.bf16.msra.mxu1 %v1781_v3 }
 0x26b   :  { %1591 = vmatprep.subr.bf16.mxu1 %v1940_v33 }
 0x26e   :  { %1592 = vmatpush3.bf16.msra.mxu1 %v1782_v5 }
 0x26f   :  { %1593 = vmatprep.subr.bf16.mxu1 %v1940_v33 }
 0x272   :  { %1594 = vmatpush3.bf16.msra.mxu1 %v1783_v62 }
 0x273   :  { %1595 = vmatprep.subr.bf16.mxu1 %v1940_v33 }
 0x276   :  { %1596 = vmatpush3.bf16.msra.mxu1 %v1784_v63 }
 0x277   :  { %1597 = vmatprep.subr.bf16.mxu1 %v1940_v33 }
 0x27a   :  { %1598 = vmatpush3.bf16.msra.mxu1 %v1785_v0 }
 0x27d   :  { %1600 = vmatmul.mubr.bf16.vlgmr.msra.gmra.mrb[16].mxu1 %v1078_v4 }
 0x330   :  { %v1568_v6 = vpop.f32.mrb[12].mxu1 }
 0x331   :  { %v1569_v7 = vpop.f32.mrb[13].mxu1 }
 0x332   :  { %v1570_v8 = vadd.f32 %v1569_v7, %v1568_v6  ;;  %v1571_v9 = vpop.f32.mrb[14].mxu1 }
 0x333   :  { %v1572_v10 = vpop.f32.mrb[15].mxu1 }
 0x334   :  { %v1311_v12 = vadd.f32 %v1570_v8, %v1483_v11 }
 0x350   :  { %v1350_v13 = vpop.f32.mrb[16].mxu1 }
 0x351   :  { %v1351_v14 = vadd.f32 %v1350_v13, %v1311_v12  ;;  %v1601_v15 = vpop.f32.mrb[17].mxu1 }
 0x352   :  { %v1353_v16 = vpop.f32.mrb[18].mxu1 }
 0x353   :  { %1786 = vtanh.f32 %v1351_v14  ;;  %v1602_v17 = vpop.f32.mrb[19].mxu1 }
 0x35d   :  { %v1787_v18 = vpop.eup %1786 }
 0x35e   :  { %1357 = vst [vmem:[#allocation11] sm:$0xff] %v1787_v18 }
 0x35f   :  { %1909 = shalt.err (!%p1906_p2)
}
 0x360   :  { %s1910_s7 = scalar_lea.hbm %s2088_s5, 128 }
 0x361   :  { %p1911_p3 = scmp.ne.s32.totalorder %s2088_s5, %s1910_s7  ;;  %p1914_p4 = scmp.lt.u32.totalorder %s1910_s7, %s2088_s5 }
 0x363   :  { %p1916_p5 = pnand %p1914_p4, %p1911_p3 }
 0x365   :  { %1919 = shalt.err (!%p1916_p5)
}
 0x366   :  { %1367 = dma.vmem_to_hbm [thread:$0]  %s1365_s29, 128, %s2088_s5, [#allocation4]  }
 0x367   :  { %1926 = dma.done.wait [#allocation4], 128  }
 0x368   :  { %1927 = vsyncadd [#allocation4], 4294967168 }
 0x369   :  { %1371 = vsyncpa [#allocation3], 1 }
 0x36a   :  { %1372 = vsyncpa [#allocation6], 1 }
 0x36b   :  { %1373 = vsyncpa [#allocation9], 1 }
 0x36c   :  { %1374 = vsyncpa [#allocation4], 1 }

</bundles_post_ra>
